<compile_context>
chip_gen: v7x
topology: tpu7x:2x2x1
jax: 0.10.0
libtpu: 0.0.40
codegen_flags: <defaults>
</compile_context>

<pallas_src>
import functools

import jax
import jax.numpy as jnp
from jax import lax
from jax.experimental import pallas as pl
from jax.experimental.pallas import tpu as pltpu

BN_EPS = 1e-5


def _round_up(x, m):
    return (x + m - 1) // m * m


# ----------------------------------------------------------------------------
# Kernel A: conv-as-matmul (MXU) + per-channel batch statistics.
#   grid = (n_m_tiles,)   -- sequential ("arbitrary"): carries running stats
#   p_ref:  [tm, Kd]  bf16 patch tile
#   w_ref:  [Kd, Cp]  bf16 flattened weights (Cp = 128-padded Cout)
#   g_ref / b_ref: [1, Cp] f32 BN gamma / beta (zero-padded)
#   y_ref:  [tm, Cp]  bf16 pre-BN activation (written once, read by kernel B)
#   scale_ref / shift_ref: [1, Cp] f32, written on the last tile only
# ----------------------------------------------------------------------------
def conv_stats_kernel(p_ref, w_ref, g_ref, b_ref,
                      y_ref, scale_ref, shift_ref,
                      sum_ref, ssq_ref, *, inv_m, eps):
    i = pl.program_id(0)
    n = pl.num_programs(0)

    @pl.when(i == 0)
    def _init():
        sum_ref[...] = jnp.zeros_like(sum_ref)
        ssq_ref[...] = jnp.zeros_like(ssq_ref)

    # Conv bias omitted on purpose: it cancels exactly under batch-stat BN.
    y32 = jnp.dot(p_ref[...], w_ref[...], preferred_element_type=jnp.float32)
    yb = y32.astype(jnp.bfloat16)
    y_ref[...] = yb                       # single bf16 writeback of pre-BN y
    yf = yb.astype(jnp.float32)           # stats over the values actually stored
    sum_ref[...] += jnp.sum(yf, axis=0, keepdims=True)
    ssq_ref[...] += jnp.sum(yf * yf, axis=0, keepdims=True)

    @pl.when(i == n - 1)
    def _finalize():
        mean = sum_ref[...] * inv_m
        # E[y^2]-E[y]^2 in f32; clamp tiny negative round-off.  (If cancellation
        # becomes an issue at scale, switch to shifted sums.)
        var = jnp.maximum(ssq_ref[...] * inv_m - mean * mean, 0.0)
        scale = g_ref[...] * lax.rsqrt(var + eps)
        scale_ref[...] = scale
        shift_ref[...] = b_ref[...] - scale * mean


# ----------------------------------------------------------------------------
# Kernel B: fused per-channel affine + ReLU over the stored pre-BN y tiles.
# ----------------------------------------------------------------------------
def bn_relu_kernel(y_ref, scale_ref, shift_ref, o_ref):
    y = y_ref[...].astype(jnp.float32)
    o_ref[...] = jnp.maximum(y * scale_ref[...] + shift_ref[...], 0.0
                             ).astype(o_ref.dtype)


def _vmem_budget_bytes(tm, kd, cp):
    """Double-buffered working set of kernel A (the larger of the two)."""
    return (2 * tm * kd * 2      # patch tiles (bf16)
            + 2 * kd * cp * 2    # weight block (bf16)
            + 4 * cp * 4         # gamma + beta blocks (f32)
            + 2 * tm * cp * 2    # y output tiles (bf16)
            + 4 * cp * 4         # scale + shift output blocks (f32)
            + 2 * cp * 4)        # sum / ssq scratch (f32)


def fused_conv_bn_relu(patches, w_mat, gamma, beta, m_true, *, tile_m=1024):
    """patches: [M, Kd] bf16, w_mat: [Kd, Cout] bf16 -> [M, Cout] bf16."""
    M, Kd = patches.shape
    Cout = w_mat.shape[1]
    Cp = _round_up(Cout, 128)            # lane-dense output (unmasked stores)

    # Big M tiles amortize per-grid-step overhead; 16-row granularity keeps
    # bf16 sublane packing.  Shrink only if the working set blows the budget.
    tm = tile_m if M >= tile_m else _round_up(M, 16)
    while tm > 256 and _vmem_budget_bytes(tm, Kd, Cp) > (40 << 20):
        tm //= 2
    Mp = _round_up(M, tm)
    n_tiles = Mp // tm

    vmem_limit = int(min(max(_vmem_budget_bytes(tm, Kd, Cp) * 3 // 2 + (4 << 20),
                             32 << 20), 64 << 20))

    # Zero padding is numerically inert: padded rows give y == 0 which adds
    # nothing to sum/ssq (true M is divided out); padded channels are sliced off.
    p_pad = jnp.pad(patches, ((0, Mp - M), (0, 0)))
    w_pad = jnp.pad(w_mat, ((0, 0), (0, Cp - Cout)))
    g_pad = jnp.pad(gamma.reshape(1, Cout).astype(jnp.float32),
                    ((0, 0), (0, Cp - Cout)))
    b_pad = jnp.pad(beta.reshape(1, Cout).astype(jnp.float32),
                    ((0, 0), (0, Cp - Cout)))

    y, scale, shift = pl.pallas_call(
        functools.partial(conv_stats_kernel,
                          inv_m=1.0 / float(m_true), eps=BN_EPS),
        out_shape=(jax.ShapeDtypeStruct((Mp, Cp), jnp.bfloat16),
                   jax.ShapeDtypeStruct((1, Cp), jnp.float32),
                   jax.ShapeDtypeStruct((1, Cp), jnp.float32)),
        grid=(n_tiles,),
        in_specs=[
            pl.BlockSpec((tm, Kd), lambda i: (i, 0)),   # Kd == full array dim
            pl.BlockSpec((Kd, Cp), lambda i: (0, 0)),
            pl.BlockSpec((1, Cp), lambda i: (0, 0)),
            pl.BlockSpec((1, Cp), lambda i: (0, 0)),
        ],
        out_specs=(
            pl.BlockSpec((tm, Cp), lambda i: (i, 0)),
            pl.BlockSpec((1, Cp), lambda i: (0, 0)),    # resident; written last
            pl.BlockSpec((1, Cp), lambda i: (0, 0)),
        ),
        scratch_shapes=[
            pltpu.VMEM((1, Cp), jnp.float32),   # running sum(y)
            pltpu.VMEM((1, Cp), jnp.float32),   # running sum(y^2)
        ],
        compiler_params=pltpu.CompilerParams(
            dimension_semantics=("arbitrary",),          # carries running stats
            vmem_limit_bytes=vmem_limit),
    )(p_pad, w_pad, g_pad, b_pad)

    out = pl.pallas_call(
        bn_relu_kernel,
        out_shape=jax.ShapeDtypeStruct((Mp, Cp), jnp.bfloat16),
        grid=(n_tiles,),
        in_specs=[
            pl.BlockSpec((tm, Cp), lambda i: (i, 0)),
            pl.BlockSpec((1, Cp), lambda i: (0, 0)),
            pl.BlockSpec((1, Cp), lambda i: (0, 0)),
        ],
        out_specs=pl.BlockSpec((tm, Cp), lambda i: (i, 0)),
        compiler_params=pltpu.CompilerParams(
            dimension_semantics=("parallel",),
            vmem_limit_bytes=vmem_limit),
    )(y, scale, shift)

    return out[:M, :Cout]


# ----------------------------------------------------------------------------
# Glue: im2col patch extraction (NHWC, bf16), weight flattening, layer apply.
# ----------------------------------------------------------------------------
def im2col_nhwc(x, k, stride, pad):
    """x: [N, H, W, C] -> bf16 patches [N*Ho*Wo, k*k*C] ordered (kh, kw, c)."""
    n, h, w, c = x.shape
    x = x.astype(jnp.bfloat16)            # bf16 end-to-end: patch matrix is bf16
    xp = jnp.pad(x, ((0, 0), (pad, pad), (pad, pad), (0, 0)))
    ho = (h + 2 * pad - k) // stride + 1
    wo = (w + 2 * pad - k) // stride + 1
    cols = []
    for kh in range(k):
        for kw in range(k):
            cols.append(
                xp[:, kh: kh + (ho - 1) * stride + 1: stride,
                      kw: kw + (wo - 1) * stride + 1: stride, :])
    patches = jnp.stack(cols, axis=3)                 # [N, Ho, Wo, k*k, C]
    return patches.reshape(n * ho * wo, k * k * c), ho, wo


def conv_bn_relu_layer(x_nhwc, params, k, stride, pad):
    """One Conv2d + BatchNorm2d(training batch stats) + ReLU layer."""
    w, _b, gamma, beta = params     # conv bias unused: cancels under batch BN
    n = x_nhwc.shape[0]
    cout, cin = w.shape[0], w.shape[1]
    patches, ho, wo = im2col_nhwc(x_nhwc, k, stride, pad)
    # [Cout, Cin, K, K] -> [K, K, Cin, Cout] -> [K*K*Cin, Cout] (matches patches)
    w_mat = jnp.transpose(w, (2, 3, 1, 0)).reshape(k * k * cin, cout)
    out = fused_conv_bn_relu(patches, w_mat.astype(jnp.bfloat16),
                             gamma, beta, m_true=n * ho * wo)
    return out.reshape(n, ho, wo, cout)


# ----------------------------------------------------------------------------
# Module: parameter init + forward
# ----------------------------------------------------------------------------
def init_params(key, in_size, hidden_size):
    cfgs = [
        (in_size, hidden_size // 8, 7),
        (hidden_size // 8, hidden_size // 4, 3),
        (hidden_size // 4, hidden_size // 2, 3),
        (hidden_size // 2, hidden_size, 3),
    ]
    params = []
    for cin, cout, k in cfgs:
        key, kw, kb = jax.random.split(key, 3)
        fan_in = cin * k * k
        bound = 1.0 / jnp.sqrt(fan_in)
        w = jax.random.uniform(kw, (cout, cin, k, k), jnp.float32, -bound, bound)
        b = jax.random.uniform(kb, (cout,), jnp.float32, -bound, bound)
        gamma = jnp.ones((cout,), jnp.float32)   # BatchNorm2d default weight
        beta = jnp.zeros((cout,), jnp.float32)   # BatchNorm2d default bias
        params.append((w, b, gamma, beta))
    return params


def image_embeddings_forward(x_nchw, params):
    """Matches ImageEmbeddings.forward; input/output are NCHW like PyTorch."""
    x = jnp.transpose(x_nchw, (0, 2, 3, 1))                 # NCHW -> NHWC
    x = conv_bn_relu_layer(x, params[0], k=7, stride=2, pad=3)
    x = conv_bn_relu_layer(x, params[1], k=3, stride=2, pad=1)
    x = conv_bn_relu_layer(x, params[2], k=3, stride=2, pad=1)
    x = conv_bn_relu_layer(x, params[3], k=3, stride=2, pad=1)
    return jnp.transpose(x, (0, 3, 1, 2)).astype(jnp.float32)   # NHWC -> NCHW


# ----------------------------------------------------------------------------
# Pure-JAX reference (train-mode BN, conv bias included) mirroring the kernel's
# bf16 operand quantization and bf16 pre-BN activation storage; used as a
# numerical sanity check.
# ----------------------------------------------------------------------------
def _reference_layer(x_nhwc, params, k, stride, pad):
    w, b, gamma, beta = params
    w_hwio = jnp.transpose(w, (2, 3, 1, 0)).astype(jnp.bfloat16).astype(jnp.float32)
    xq = x_nhwc.astype(jnp.bfloat16).astype(jnp.float32)
    y = lax.conv_general_dilated(
        xq, w_hwio, window_strides=(stride, stride),
        padding=[(pad, pad), (pad, pad)],
        dimension_numbers=("NHWC", "HWIO", "NHWC"))
    y = y.astype(jnp.bfloat16).astype(jnp.float32)   # mirror kernel's bf16 y store
    # Bias added in f32: under batch-stat BN it cancels exactly, which is what
    # the kernel exploits by never adding it.
    y = y + b.reshape(1, 1, 1, -1)
    mean = jnp.mean(y, axis=(0, 1, 2), keepdims=True)
    var = jnp.mean((y - mean) ** 2, axis=(0, 1, 2), keepdims=True)
    y = (y - mean) * lax.rsqrt(var + BN_EPS)
    y = gamma.reshape(1, 1, 1, -1) * y + beta.reshape(1, 1, 1, -1)
    return jnp.maximum(y, 0.0)


def _reference_forward(x_nchw, params):
    x = jnp.transpose(x_nchw, (0, 2, 3, 1))
    x = _reference_layer(x, params[0], 7, 2, 3)
    x = _reference_layer(x, params[1], 3, 2, 1)
    x = _reference_layer(x, params[2], 3, 2, 1)
    x = _reference_layer(x, params[3], 3, 2, 1)
    return jnp.transpose(x, (0, 3, 1, 2))


if __name__ == "__main__":
    key = jax.random.PRNGKey(0)
    key, kx = jax.random.split(key)

    batch, in_size, spatial, hidden_size = 2, 4, 32, 32
    x = jax.random.normal(kx, (batch, in_size, spatial, spatial), jnp.float32)

    params = init_params(key, in_size, hidden_size)
    out = jax.block_until_ready(image_embeddings_forward(x, params))

    assert out.shape == (batch, hidden_size, spatial // 16, spatial // 16), out.shape
    assert bool(jnp.all(jnp.isfinite(out)))

    ref = jax.block_until_ready(_reference_forward(x, params))
    # Tolerance covers bf16 activation storage (BN output is O(1), so safe).
    assert bool(jnp.allclose(out, ref, atol=5e-2, rtol=5e-2)), \
        float(jnp.max(jnp.abs(out - ref)))

    print("KERNEL_OK")
</pallas_src>

<mosaic_0001>
module attributes {stable_mosaic.version = 11 : i64} {
  func.func @conv_stats_kernel(%arg0: i32, %arg1: memref<512x196xbf16, #tpu.memory_space<vmem>>, %arg2: memref<196x128xbf16, #tpu.memory_space<vmem>>, %arg3: memref<1x128xf32, #tpu.memory_space<vmem>>, %arg4: memref<1x128xf32, #tpu.memory_space<vmem>>, %arg5: memref<512x128xbf16, #tpu.memory_space<vmem>>, %arg6: memref<1x128xf32, #tpu.memory_space<vmem>>, %arg7: memref<1x128xf32, #tpu.memory_space<vmem>>, %arg8: memref<1x128xf32, #tpu.memory_space<vmem>>, %arg9: memref<1x128xf32, #tpu.memory_space<vmem>>) attributes {dimension_semantics = [#tpu.dimension_semantics<arbitrary>], iteration_bounds = array<i64: 1>, scalar_prefetch = 0 : i64, scratch_operands = 2 : i64, tpu.core_type = #tpu.core_type<tc>, window_params = [{transform_indices = @transform_0, window_bounds = array<i64: 512, 196>}, {pipeline_mode = #tpu.pipeline_mode<synchronous>, transform_indices = @transform_1, window_bounds = array<i64: 196, 128>}, {pipeline_mode = #tpu.pipeline_mode<synchronous>, transform_indices = @transform_2, window_bounds = array<i64: 1, 128>}, {pipeline_mode = #tpu.pipeline_mode<synchronous>, transform_indices = @transform_3, window_bounds = array<i64: 1, 128>}, {transform_indices = @transform_4, window_bounds = array<i64: 512, 128>}, {pipeline_mode = #tpu.pipeline_mode<synchronous>, transform_indices = @transform_5, window_bounds = array<i64: 1, 128>}, {pipeline_mode = #tpu.pipeline_mode<synchronous>, transform_indices = @transform_6, window_bounds = array<i64: 1, 128>}]} {
    %c0_i32 = arith.constant 0 : i32
    %0 = arith.cmpi eq, %arg0, %c0_i32 : i32
    %1 = arith.extui %0 : i1 to i32
    %c0_i32_0 = arith.constant 0 : i32
    %2 = arith.cmpi ne, %1, %c0_i32_0 : i32
    scf.if %2 {
      %cst_18 = arith.constant 0.000000e+00 : f32
      %23 = vector.broadcast %cst_18 : f32 to vector<1x128xf32>
      %c0_19 = arith.constant 0 : index
      %c0_20 = arith.constant 0 : index
      %24 = vector.load %arg8[%c0_19, %c0_20] : memref<1x128xf32, #tpu.memory_space<vmem>>, vector<1x128xf32>
      tpu.vector_store %arg8[%c0_19, %c0_20], %23 {strides = array<i32>} : memref<1x128xf32, #tpu.memory_space<vmem>>, vector<1x128xf32>,
      %cst_21 = arith.constant 0.000000e+00 : f32
      %25 = vector.broadcast %cst_21 : f32 to vector<1x128xf32>
      %c0_22 = arith.constant 0 : index
      %c0_23 = arith.constant 0 : index
      %26 = vector.load %arg9[%c0_22, %c0_23] : memref<1x128xf32, #tpu.memory_space<vmem>>, vector<1x128xf32>
      tpu.vector_store %arg9[%c0_22, %c0_23], %25 {strides = array<i32>} : memref<1x128xf32, #tpu.memory_space<vmem>>, vector<1x128xf32>,
    } else {
    }
    %c0 = arith.constant 0 : index
    %c0_1 = arith.constant 0 : index
    %3 = vector.load %arg1[%c0, %c0_1] : memref<512x196xbf16, #tpu.memory_space<vmem>>, vector<512x196xbf16>
    %c0_2 = arith.constant 0 : index
    %c0_3 = arith.constant 0 : index
    %4 = vector.load %arg2[%c0_2, %c0_3] : memref<196x128xbf16, #tpu.memory_space<vmem>>, vector<196x128xbf16>
    %cst = arith.constant dense<0.000000e+00> : vector<512x128xf32>
    %5 = tpu.matmul %3, %4, %cst {dimension_numbers = #tpu.dot_dimension_numbers<[1], [0], [0], [1], [0, 0, 1, 1], [], []>} : vector<512x196xbf16>, vector<196x128xbf16>, vector<512x128xf32> -> vector<512x128xf32>
    %6 = arith.truncf %5 : vector<512x128xf32> to vector<512x128xbf16>
    %c0_4 = arith.constant 0 : index
    %c0_5 = arith.constant 0 : index
    %7 = vector.load %arg5[%c0_4, %c0_5] : memref<512x128xbf16, #tpu.memory_space<vmem>>, vector<512x128xbf16>
    tpu.vector_store %arg5[%c0_4, %c0_5], %6 {strides = array<i32>} : memref<512x128xbf16, #tpu.memory_space<vmem>>, vector<512x128xbf16>,
    %8 = arith.extf %6 : vector<512x128xbf16> to vector<512x128xf32>
    %c0_6 = arith.constant 0 : index
    %c0_7 = arith.constant 0 : index
    %9 = vector.load %arg8[%c0_6, %c0_7] : memref<1x128xf32, #tpu.memory_space<vmem>>, vector<1x128xf32>
    %cst_8 = arith.constant dense<0.000000e+00> : vector<128xf32>
    %10 = vector.multi_reduction <add>, %8, %cst_8 [0] : vector<512x128xf32> to vector<128xf32>
    %11 = vector.shape_cast %10 : vector<128xf32> to vector<1x128xf32>
    %12 = arith.addf %9, %11 : vector<1x128xf32>
    %c0_9 = arith.constant 0 : index
    %c0_10 = arith.constant 0 : index
    %13 = vector.load %arg8[%c0_9, %c0_10] : memref<1x128xf32, #tpu.memory_space<vmem>>, vector<1x128xf32>
    tpu.vector_store %arg8[%c0_9, %c0_10], %12 {strides = array<i32>} : memref<1x128xf32, #tpu.memory_space<vmem>>, vector<1x128xf32>,
    %c0_11 = arith.constant 0 : index
    %c0_12 = arith.constant 0 : index
    %14 = vector.load %arg9[%c0_11, %c0_12] : memref<1x128xf32, #tpu.memory_space<vmem>>, vector<1x128xf32>
    %15 = arith.mulf %8, %8 : vector<512x128xf32>
    %cst_13 = arith.constant dense<0.000000e+00> : vector<128xf32>
    %16 = vector.multi_reduction <add>, %15, %cst_13 [0] : vector<512x128xf32> to vector<128xf32>
    %17 = vector.shape_cast %16 : vector<128xf32> to vector<1x128xf32>
    %18 = arith.addf %14, %17 : vector<1x128xf32>
    %c0_14 = arith.constant 0 : index
    %c0_15 = arith.constant 0 : index
    %19 = vector.load %arg9[%c0_14, %c0_15] : memref<1x128xf32, #tpu.memory_space<vmem>>, vector<1x128xf32>
    tpu.vector_store %arg9[%c0_14, %c0_15], %18 {strides = array<i32>} : memref<1x128xf32, #tpu.memory_space<vmem>>, vector<1x128xf32>,
    %c0_i32_16 = arith.constant 0 : i32
    %20 = arith.cmpi eq, %arg0, %c0_i32_16 : i32
    %21 = arith.extui %20 : i1 to i32
    %c0_i32_17 = arith.constant 0 : i32
    %22 = arith.cmpi ne, %21, %c0_i32_17 : i32
    scf.if %22 {
      %c0_18 = arith.constant 0 : index
      %c0_19 = arith.constant 0 : index
      %23 = vector.load %arg8[%c0_18, %c0_19] : memref<1x128xf32, #tpu.memory_space<vmem>>, vector<1x128xf32>
      %cst_20 = arith.constant 0.001953125 : f32
      %24 = vector.broadcast %cst_20 : f32 to vector<1x128xf32>
      %25 = arith.mulf %23, %24 : vector<1x128xf32>
      %c0_21 = arith.constant 0 : index
      %c0_22 = arith.constant 0 : index
      %26 = vector.load %arg9[%c0_21, %c0_22] : memref<1x128xf32, #tpu.memory_space<vmem>>, vector<1x128xf32>
      %cst_23 = arith.constant 0.001953125 : f32
      %27 = vector.broadcast %cst_23 : f32 to vector<1x128xf32>
      %28 = arith.mulf %26, %27 : vector<1x128xf32>
      %29 = arith.mulf %25, %25 : vector<1x128xf32>
      %30 = arith.subf %28, %29 : vector<1x128xf32>
      %cst_24 = arith.constant 0.000000e+00 : f32
      %31 = vector.broadcast %cst_24 : f32 to vector<1x128xf32>
      %32 = arith.maximumf %30, %31 : vector<1x128xf32>
      %c0_25 = arith.constant 0 : index
      %c0_26 = arith.constant 0 : index
      %33 = vector.load %arg3[%c0_25, %c0_26] : memref<1x128xf32, #tpu.memory_space<vmem>>, vector<1x128xf32>
      %cst_27 = arith.constant 9.99999974E-6 : f32
      %34 = vector.broadcast %cst_27 : f32 to vector<1x128xf32>
      %35 = arith.addf %32, %34 : vector<1x128xf32>
      %36 = math.rsqrt %35 : vector<1x128xf32>
      %37 = arith.mulf %33, %36 : vector<1x128xf32>
      %c0_28 = arith.constant 0 : index
      %c0_29 = arith.constant 0 : index
      %38 = vector.load %arg6[%c0_28, %c0_29] : memref<1x128xf32, #tpu.memory_space<vmem>>, vector<1x128xf32>
      tpu.vector_store %arg6[%c0_28, %c0_29], %37 {strides = array<i32>} : memref<1x128xf32, #tpu.memory_space<vmem>>, vector<1x128xf32>,
      %c0_30 = arith.constant 0 : index
      %c0_31 = arith.constant 0 : index
      %39 = vector.load %arg4[%c0_30, %c0_31] : memref<1x128xf32, #tpu.memory_space<vmem>>, vector<1x128xf32>
      %40 = arith.mulf %37, %25 : vector<1x128xf32>
      %41 = arith.subf %39, %40 : vector<1x128xf32>
      %c0_32 = arith.constant 0 : index
      %c0_33 = arith.constant 0 : index
      %42 = vector.load %arg7[%c0_32, %c0_33] : memref<1x128xf32, #tpu.memory_space<vmem>>, vector<1x128xf32>
      tpu.vector_store %arg7[%c0_32, %c0_33], %41 {strides = array<i32>} : memref<1x128xf32, #tpu.memory_space<vmem>>, vector<1x128xf32>,
    } else {
    }
    return
  }
  func.func @transform_0(%arg0: i32) -> (i32, i32) {
    %c0_i32 = arith.constant 0 : i32
    %c0_i32_0 = arith.constant 0 : i32
    return %arg0, %c0_i32 : i32, i32
  }
  func.func @transform_1(%arg0: i32) -> (i32, i32) {
    %c0_i32 = arith.constant 0 : i32
    %c0_i32_0 = arith.constant 0 : i32
    %c0_i32_1 = arith.constant 0 : i32
    return %c0_i32, %c0_i32_0 : i32, i32
  }
  func.func @transform_2(%arg0: i32) -> (i32, i32) {
    %c0_i32 = arith.constant 0 : i32
    %c0_i32_0 = arith.constant 0 : i32
    %c0_i32_1 = arith.constant 0 : i32
    return %c0_i32, %c0_i32_0 : i32, i32
  }
  func.func @transform_3(%arg0: i32) -> (i32, i32) {
    %c0_i32 = arith.constant 0 : i32
    %c0_i32_0 = arith.constant 0 : i32
    %c0_i32_1 = arith.constant 0 : i32
    return %c0_i32, %c0_i32_0 : i32, i32
  }
  func.func @transform_4(%arg0: i32) -> (i32, i32) {
    %c0_i32 = arith.constant 0 : i32
    %c0_i32_0 = arith.constant 0 : i32
    return %arg0, %c0_i32 : i32, i32
  }
  func.func @transform_5(%arg0: i32) -> (i32, i32) {
    %c0_i32 = arith.constant 0 : i32
    %c0_i32_0 = arith.constant 0 : i32
    %c0_i32_1 = arith.constant 0 : i32
    return %c0_i32, %c0_i32_0 : i32, i32
  }
  func.func @transform_6(%arg0: i32) -> (i32, i32) {
    %c0_i32 = arith.constant 0 : i32
    %c0_i32_0 = arith.constant 0 : i32
    %c0_i32_1 = arith.constant 0 : i32
    return %c0_i32, %c0_i32_0 : i32, i32
  }
}

</mosaic_0001>

<bundles_post_ra>
// kernel: tpu_custom_call.1
= control target key start
LH: loop header
LB: loop body
LE: loop exit
PB: predicated region body
PF: predicated region fallthrough
CT: control target
= control target key end

     0   :  { %12 = vsyncpa [#allocation5], 0  ;;  %v2167_v1 = vmov 0   ;;  %vm481_vm0 = vcmask 556032   ;;  %vm578_vm1 = vcmask 1041408   ;;  %s2620_s0 = inlined_call_operand.vmem [shape: bf16[512,196], index: 0, kind: input, shape index: {}]   ;;  %s2621_s1 = inlined_call_operand.vmem [shape: bf16[196,128], index: 1, kind: input, shape index: {}]   ;;  %s2622_s2 = inlined_call_operand.vmem [shape: f32[1,128], index: 2, kind: input, shape index: {}]   ;;  %s2623_s3 = inlined_call_operand.vmem [shape: f32[1,128], index: 3, kind: input, shape index: {}]   ;;  %s2624_s4 = inlined_call_operand.hbm [shape: bf16[512,128], index: 4, kind: output, shape index: {0}]   ;;  %s2625_s5 = inlined_call_operand.hbm [shape: f32[1,128], index: 5, kind: output, shape index: {1}]   ;;  %s2626_s6 = inlined_call_operand.hbm [shape: f32[1,128], index: 6, kind: output, shape index: {2}]  }
   0x1   :  { %v1986_v0 = vld [vmem:[%s2621_s1] sm:$0xff]   ;;  %582 = vmatprep.subr.bf16.mxu0 %v2167_v1  ;;  %1953 = vmatprep.subr.bf16.mxu1 %v2167_v1  ;;  %v1987_v2 = vld [vmem:[%s2621_s1 + $0x8] sm:$0xff]   ;;  %v1988_v3 = vld [vmem:[%s2621_s1 + $0x10] sm:$0xff]  }
   0x2   :  { %583 = vmatpush1.bf16.msra.mxu0 %v1986_v0  ;;  %1966 = vmatpush1.bf16.msra.mxu1 %v1986_v0  ;;  %v1989_v4 = vld [vmem:[%s2621_s1 + $0x18] sm:$0xff]   ;;  %v2001_v5 = vld [vmem:[%s2620_s0 + $0x4] ss:$8 sps:$4 sm:$0xff]   ;;  %v1992_v8 = vld [vmem:[%s2621_s1 + $0x30] sm:$0xff]  }
   0x3   :  { %584 = vmatprep.subr.bf16.mxu0 %v2167_v1  ;;  %1954 = vmatprep.subr.bf16.mxu1 %v2167_v1  ;;  %v1990_v6 = vld [vmem:[%s2621_s1 + $0x20] sm:$0xff]   ;;  %v1991_v7 = vld [vmem:[%s2621_s1 + $0x28] sm:$0xff]   ;;  %v1993_v10 = vld [vmem:[%s2621_s1 + $0x38] sm:$0xff]  }
   0x4   :  { %1602 = vmatprep.mubr.msk.bf16.mxu0 %vm481_vm0, %v2001_v5  ;;  %v2025_v9 = vld [vmem:[%s2620_s0 + $0x104] ss:$8 sps:$4 sm:$0xff]   ;;  %v1996_v13 = vld [vmem:[%s2621_s1 + $0x50] sm:$0xff]   ;;  %v1997_v14 = vld [vmem:[%s2621_s1 + $0x58] sm:$0xff]  }
   0x5   :  { %1618 = vmatprep.mubr.msk.bf16.mxu1 %vm481_vm0, %v2025_v9  ;;  %v1994_v11 = vld [vmem:[%s2621_s1 + $0x40] sm:$0xff]   ;;  %v1995_v12 = vld [vmem:[%s2621_s1 + $0x48] sm:$0xff]   ;;  %v2002_v18 = vld [vmem:[%s2620_s0 + $0x14] ss:$8 sps:$4 sm:$0xff]  }
   0x6   :  { %585 = vmatpush1.bf16.msra.mxu0 %v1987_v2  ;;  %1967 = vmatpush1.bf16.msra.mxu1 %v1987_v2  ;;  %v1998_v15 = vld [vmem:[%s2621_s1 + $0x60] ss:$0 sps:$4 sm:$0x33]   ;;  %v2029_v20 = vld [vmem:[%s2620_s0 + $0x114] ss:$8 sps:$4 sm:$0xff]  }
   0x7   :  { %586 = vmatprep.subr.bf16.mxu0 %v2167_v1  ;;  %1955 = vmatprep.subr.bf16.mxu1 %v2167_v1  ;;  %v580_v16 = vsel %vm578_vm1, %v1998_v15, 0  ;;  %v1999_v17 = vld [vmem:[%s2620_s0] ss:$8 sps:$4 sm:$0xff]  }
   0x8   :  { %v2023_v19 = vld [vmem:[%s2620_s0 + $0x100] ss:$8 sps:$4 sm:$0xff]  }
   0xa   :  { %587 = vmatpush1.bf16.msra.mxu0 %v1988_v3  ;;  %1968 = vmatpush1.bf16.msra.mxu1 %v1988_v3 }
   0xb   :  { %588 = vmatprep.subr.bf16.mxu0 %v2167_v1  ;;  %1956 = vmatprep.subr.bf16.mxu1 %v2167_v1 }
   0xe   :  { %589 = vmatpush1.bf16.msra.mxu0 %v1989_v4  ;;  %1969 = vmatpush1.bf16.msra.mxu1 %v1989_v4 }
   0xf   :  { %590 = vmatprep.subr.bf16.mxu0 %v2167_v1  ;;  %1957 = vmatprep.subr.bf16.mxu1 %v2167_v1 }
  0x12   :  { %591 = vmatpush1.bf16.msra.mxu0 %v1990_v6  ;;  %1970 = vmatpush1.bf16.msra.mxu1 %v1990_v6 }
  0x13   :  { %592 = vmatprep.subr.bf16.mxu0 %v2167_v1  ;;  %1958 = vmatprep.subr.bf16.mxu1 %v2167_v1 }
  0x16   :  { %593 = vmatpush1.bf16.msra.mxu0 %v1991_v7  ;;  %1971 = vmatpush1.bf16.msra.mxu1 %v1991_v7 }
  0x17   :  { %594 = vmatprep.subr.bf16.mxu0 %v2167_v1  ;;  %1959 = vmatprep.subr.bf16.mxu1 %v2167_v1 }
  0x1a   :  { %595 = vmatpush1.bf16.msra.mxu0 %v1992_v8  ;;  %1972 = vmatpush1.bf16.msra.mxu1 %v1992_v8 }
  0x1b   :  { %596 = vmatprep.subr.bf16.mxu0 %v2167_v1  ;;  %1960 = vmatprep.subr.bf16.mxu1 %v2167_v1 }
  0x1e   :  { %597 = vmatpush1.bf16.msra.mxu0 %v1993_v10  ;;  %1973 = vmatpush1.bf16.msra.mxu1 %v1993_v10 }
  0x1f   :  { %598 = vmatprep.subr.bf16.mxu0 %v2167_v1  ;;  %1961 = vmatprep.subr.bf16.mxu1 %v2167_v1 }
  0x22   :  { %599 = vmatpush1.bf16.msra.mxu0 %v1994_v11  ;;  %1974 = vmatpush1.bf16.msra.mxu1 %v1994_v11 }
  0x23   :  { %600 = vmatprep.subr.bf16.mxu0 %v2167_v1  ;;  %1962 = vmatprep.subr.bf16.mxu1 %v2167_v1 }
  0x26   :  { %601 = vmatpush1.bf16.msra.mxu0 %v1995_v12  ;;  %1975 = vmatpush1.bf16.msra.mxu1 %v1995_v12 }
  0x27   :  { %602 = vmatprep.subr.bf16.mxu0 %v2167_v1  ;;  %1963 = vmatprep.subr.bf16.mxu1 %v2167_v1 }
  0x2a   :  { %603 = vmatpush1.bf16.msra.mxu0 %v1996_v13  ;;  %1976 = vmatpush1.bf16.msra.mxu1 %v1996_v13 }
  0x2b   :  { %604 = vmatprep.subr.bf16.mxu0 %v2167_v1  ;;  %1964 = vmatprep.subr.bf16.mxu1 %v2167_v1 }
  0x2e   :  { %605 = vmatpush1.bf16.msra.mxu0 %v1997_v14  ;;  %1977 = vmatpush1.bf16.msra.mxu1 %v1997_v14 }
  0x2f   :  { %606 = vmatprep.subr.bf16.mxu0 %v2167_v1  ;;  %1965 = vmatprep.subr.bf16.mxu1 %v2167_v1 }
  0x32   :  { %607 = vmatpush1.bf16.msra.mxu0 %v580_v16  ;;  %1978 = vmatpush1.bf16.msra.mxu1 %v580_v16 }
  0x35   :  { %615 = vmatmul.mubr.bf16.vlgmr.msra.gmra.mrb[0].mxu0 %v1999_v17  ;;  %743 = vmatmul.mubr.bf16.vlgmr.msra.gmra.mrb[0].mxu1 %v2023_v19 }
  0x36   :  { %1603 = vmatprep.mubr.msk.bf16.mxu0 %vm481_vm0, %v2002_v18  ;;  %1619 = vmatprep.mubr.msk.bf16.mxu1 %vm481_vm0, %v2029_v20 }
  0x37   :  { %13 = vsyncpa [#allocation7], 0  ;;  %v2004_v21 = vld [vmem:[%s2620_s0 + $0x10] ss:$8 sps:$4 sm:$0xff]   ;;  %v2005_v23 = vld [vmem:[%s2620_s0 + $0x24] ss:$8 sps:$4 sm:$0xff]  }
  0x38   :  { %v2031_v22 = vld [vmem:[%s2620_s0 + $0x110] ss:$8 sps:$4 sm:$0xff]   ;;  %v2035_v24 = vld [vmem:[%s2620_s0 + $0x124] ss:$8 sps:$4 sm:$0xff]   ;;  %v2007_v25 = vld [vmem:[%s2620_s0 + $0x20] ss:$8 sps:$4 sm:$0xff]  }
  0x39   :  { %v2037_v26 = vld [vmem:[%s2620_s0 + $0x120] ss:$8 sps:$4 sm:$0xff]   ;;  %v2008_v27 = vld [vmem:[%s2620_s0 + $0x34] ss:$8 sps:$4 sm:$0xff]   ;;  %v2010_v29 = vld [vmem:[%s2620_s0 + $0x30] ss:$8 sps:$4 sm:$0xff]  }
  0x3a   :  { %v2041_v28 = vld [vmem:[%s2620_s0 + $0x134] ss:$8 sps:$4 sm:$0xff]   ;;  %v2043_v30 = vld [vmem:[%s2620_s0 + $0x130] ss:$8 sps:$4 sm:$0xff]   ;;  %v2011_v31 = vld [vmem:[%s2620_s0 + $0x44] ss:$8 sps:$4 sm:$0xff]  }
  0x3b   :  { %v2047_v32 = vld [vmem:[%s2620_s0 + $0x144] ss:$8 sps:$4 sm:$0xff]   ;;  %v2013_v33 = vld [vmem:[%s2620_s0 + $0x40] ss:$8 sps:$4 sm:$0xff]   ;;  %v2014_v35 = vld [vmem:[%s2620_s0 + $0x54] ss:$8 sps:$4 sm:$0xff]  }
  0x3c   :  { %v2049_v34 = vld [vmem:[%s2620_s0 + $0x140] ss:$8 sps:$4 sm:$0xff]   ;;  %v2053_v36 = vld [vmem:[%s2620_s0 + $0x154] ss:$8 sps:$4 sm:$0xff]   ;;  %v2016_v37 = vld [vmem:[%s2620_s0 + $0x50] ss:$8 sps:$4 sm:$0xff]  }
  0x3d   :  { %623 = vmatmul.mubr.bf16.gmra.mrb[4].mxu0 %v2004_v21  ;;  %751 = vmatmul.mubr.bf16.gmra.mrb[4].mxu1 %v2031_v22  ;;  %v2055_v38 = vld [vmem:[%s2620_s0 + $0x150] ss:$8 sps:$4 sm:$0xff]   ;;  %v2017_v39 = vld [vmem:[%s2620_s0 + $0x64] ss:$8 sps:$4 sm:$0xff]   ;;  %v2019_v41 = vld [vmem:[%s2620_s0 + $0x60] ss:$8 sps:$4 sm:$0xff]  }
  0x3e   :  { %1604 = vmatprep.mubr.msk.bf16.mxu0 %vm481_vm0, %v2005_v23  ;;  %1620 = vmatprep.mubr.msk.bf16.mxu1 %vm481_vm0, %v2035_v24  ;;  %v2059_v40 = vld [vmem:[%s2620_s0 + $0x164] ss:$8 sps:$4 sm:$0xff]   ;;  %v2061_v42 = vld [vmem:[%s2620_s0 + $0x160] ss:$8 sps:$4 sm:$0xff]   ;;  %v2020_v43 = vld [vmem:[%s2620_s0 + $0x74] ss:$8 sps:$4 sm:$0xff]  }
  0x3f   :  { %v2065_v44 = vld [vmem:[%s2620_s0 + $0x174] ss:$8 sps:$4 sm:$0xff]   ;;  %v2022_v45 = vld [vmem:[%s2620_s0 + $0x70] ss:$8 sps:$4 sm:$0xff]   ;;  %v2026_v47 = vld [vmem:[%s2620_s0 + $0x84] ss:$8 sps:$4 sm:$0xff]  }
  0x40   :  { %v2067_v46 = vld [vmem:[%s2620_s0 + $0x170] ss:$8 sps:$4 sm:$0xff]   ;;  %v2071_v48 = vld [vmem:[%s2620_s0 + $0x184] ss:$8 sps:$4 sm:$0xff]   ;;  %v2028_v49 = vld [vmem:[%s2620_s0 + $0x80] ss:$8 sps:$4 sm:$0xff]  }
  0x41   :  { %v2073_v50 = vld [vmem:[%s2620_s0 + $0x180] ss:$8 sps:$4 sm:$0xff]   ;;  %v2032_v51 = vld [vmem:[%s2620_s0 + $0x94] ss:$8 sps:$4 sm:$0xff]   ;;  %v2034_v53 = vld [vmem:[%s2620_s0 + $0x90] ss:$8 sps:$4 sm:$0xff]  }
  0x42   :  { %v2074_v52 = vld [vmem:[%s2620_s0 + $0x194] ss:$8 sps:$4 sm:$0xff]   ;;  %v2076_v54 = vld [vmem:[%s2620_s0 + $0x190] ss:$8 sps:$4 sm:$0xff]   ;;  %v2038_v55 = vld [vmem:[%s2620_s0 + $0xa4] ss:$8 sps:$4 sm:$0xff]  }
  0x43   :  { %v2077_v56 = vld [vmem:[%s2620_s0 + $0x1a4] ss:$8 sps:$4 sm:$0xff]   ;;  %v2040_v57 = vld [vmem:[%s2620_s0 + $0xa0] ss:$8 sps:$4 sm:$0xff]   ;;  %v2044_v59 = vld [vmem:[%s2620_s0 + $0xb4] ss:$8 sps:$4 sm:$0xff]  }
  0x44   :  { %v2079_v58 = vld [vmem:[%s2620_s0 + $0x1a0] ss:$8 sps:$4 sm:$0xff]   ;;  %v2080_v60 = vld [vmem:[%s2620_s0 + $0x1b4] ss:$8 sps:$4 sm:$0xff]   ;;  %v2046_v61 = vld [vmem:[%s2620_s0 + $0xb0] ss:$8 sps:$4 sm:$0xff]  }
  0x45   :  { %631 = vmatmul.mubr.bf16.gmra.mrb[8].mxu0 %v2007_v25  ;;  %759 = vmatmul.mubr.bf16.gmra.mrb[8].mxu1 %v2037_v26  ;;  %v2082_v62 = vld [vmem:[%s2620_s0 + $0x1b0] ss:$8 sps:$4 sm:$0xff]   ;;  %v2050_v63 = vld [vmem:[%s2620_s0 + $0xc4] ss:$8 sps:$4 sm:$0xff]   ;;  %v2052_v1 = vld [vmem:[%s2620_s0 + $0xc0] ss:$8 sps:$4 sm:$0xff]  }
  0x46   :  { %1605 = vmatprep.mubr.msk.bf16.mxu0 %vm481_vm0, %v2008_v27  ;;  %1621 = vmatprep.mubr.msk.bf16.mxu1 %vm481_vm0, %v2041_v28  ;;  %v2083_v0 = vld [vmem:[%s2620_s0 + $0x1c4] ss:$8 sps:$4 sm:$0xff]   ;;  %v2085_v2 = vld [vmem:[%s2620_s0 + $0x1c0] ss:$8 sps:$4 sm:$0xff]   ;;  %v2056_v3 = vld [vmem:[%s2620_s0 + $0xd4] ss:$8 sps:$4 sm:$0xff]  }
  0x47   :  { %v2086_v4 = vld [vmem:[%s2620_s0 + $0x1d4] ss:$8 sps:$4 sm:$0xff]   ;;  %v2058_v5 = vld [vmem:[%s2620_s0 + $0xd0] ss:$8 sps:$4 sm:$0xff]   ;;  %v2062_v7 = vld [vmem:[%s2620_s0 + $0xe4] ss:$8 sps:$4 sm:$0xff]  }
  0x48   :  { %v2088_v6 = vld [vmem:[%s2620_s0 + $0x1d0] ss:$8 sps:$4 sm:$0xff]   ;;  %v2089_v8 = vld [vmem:[%s2620_s0 + $0x1e4] ss:$8 sps:$4 sm:$0xff]   ;;  %v2064_v9 = vld [vmem:[%s2620_s0 + $0xe0] ss:$8 sps:$4 sm:$0xff]  }
  0x49   :  { %v2091_v10 = vld [vmem:[%s2620_s0 + $0x1e0] ss:$8 sps:$4 sm:$0xff]   ;;  %v2068_v11 = vld [vmem:[%s2620_s0 + $0xf4] ss:$8 sps:$4 sm:$0xff]   ;;  %v2070_v13 = vld [vmem:[%s2620_s0 + $0xf0] ss:$8 sps:$4 sm:$0xff]  }
  0x4a   :  { %v2092_v12 = vld [vmem:[%s2620_s0 + $0x1f4] ss:$8 sps:$4 sm:$0xff]   ;;  %v2094_v14 = vld [vmem:[%s2620_s0 + $0x1f0] ss:$8 sps:$4 sm:$0xff]   ;;  %s2169_s0 = smov [#allocation4]  }
  0x4b   :  { %s1487_s26 = sshll.u32 %s2169_s0, 4  ;;  %s1488_s26 = int_to_ptr.vmem [resolvable:$true] %s1487_s26 }
  0x4c   :  { %s2097_s27 = scalar_lea.vmem %s1488_s26, 4096  ;;  %p2102_p1 = scmp.lt.s32.totalorder %s1488_s26, %s1488_s26 }
  0x4d   :  { %639 = vmatmul.mubr.bf16.gmra.mrb[12].mxu0 %v2010_v29  ;;  %767 = vmatmul.mubr.bf16.gmra.mrb[12].mxu1 %v2043_v30  ;;  %p2098_p0 = scmp.ne.s32.totalorder %s1488_s26, %s2097_s27  ;;  %p2103_p2 = scmp.lt.s32.totalorder %s2097_s27, %s2097_s27 }
  0x4e   :  { %1606 = vmatprep.mubr.msk.bf16.mxu0 %vm481_vm0, %v2011_v31  ;;  %1622 = vmatprep.mubr.msk.bf16.mxu1 %vm481_vm0, %v2047_v32 }
  0x4f   :  { %p2104_p3 = por %p2103_p2, %p2102_p1 }
  0x51   :  { %p2105_p4 = pnand %p2104_p3, %p2098_p0 }
  0x55   :  { %647 = vmatmul.mubr.bf16.gmra.mrb[16].mxu0 %v2013_v33  ;;  %775 = vmatmul.mubr.bf16.gmra.mrb[16].mxu1 %v2049_v34 }
  0x56   :  { %1607 = vmatprep.mubr.msk.bf16.mxu0 %vm481_vm0, %v2014_v35  ;;  %1623 = vmatprep.mubr.msk.bf16.mxu1 %vm481_vm0, %v2053_v36 }
  0x5d   :  { %655 = vmatmul.mubr.bf16.gmra.mrb[20].mxu0 %v2016_v37  ;;  %783 = vmatmul.mubr.bf16.gmra.mrb[20].mxu1 %v2055_v38 }
  0x5e   :  { %1608 = vmatprep.mubr.msk.bf16.mxu0 %vm481_vm0, %v2017_v39  ;;  %1624 = vmatprep.mubr.msk.bf16.mxu1 %vm481_vm0, %v2059_v40 }
  0x65   :  { %663 = vmatmul.mubr.bf16.gmra.mrb[24].mxu0 %v2019_v41  ;;  %791 = vmatmul.mubr.bf16.gmra.mrb[24].mxu1 %v2061_v42 }
  0x66   :  { %1609 = vmatprep.mubr.msk.bf16.mxu0 %vm481_vm0, %v2020_v43  ;;  %1625 = vmatprep.mubr.msk.bf16.mxu1 %vm481_vm0, %v2065_v44 }
  0x6d   :  { %671 = vmatmul.mubr.bf16.gmra.mrb[28].mxu0 %v2022_v45  ;;  %799 = vmatmul.mubr.bf16.gmra.mrb[28].mxu1 %v2067_v46 }
  0x6e   :  { %1610 = vmatprep.mubr.msk.bf16.mxu0 %vm481_vm0, %v2026_v47  ;;  %1626 = vmatprep.mubr.msk.bf16.mxu1 %vm481_vm0, %v2071_v48 }
  0x75   :  { %679 = vmatmul.mubr.bf16.gmra.mrb[32].mxu0 %v2028_v49  ;;  %807 = vmatmul.mubr.bf16.gmra.mrb[32].mxu1 %v2073_v50 }
  0x76   :  { %1611 = vmatprep.mubr.msk.bf16.mxu0 %vm481_vm0, %v2032_v51  ;;  %1627 = vmatprep.mubr.msk.bf16.mxu1 %vm481_vm0, %v2074_v52 }
  0x7d   :  { %687 = vmatmul.mubr.bf16.gmra.mrb[36].mxu0 %v2034_v53  ;;  %815 = vmatmul.mubr.bf16.gmra.mrb[36].mxu1 %v2076_v54 }
  0x7e   :  { %1612 = vmatprep.mubr.msk.bf16.mxu0 %vm481_vm0, %v2038_v55  ;;  %1628 = vmatprep.mubr.msk.bf16.mxu1 %vm481_vm0, %v2077_v56 }
  0x85   :  { %695 = vmatmul.mubr.bf16.gmra.mrb[40].mxu0 %v2040_v57  ;;  %823 = vmatmul.mubr.bf16.gmra.mrb[40].mxu1 %v2079_v58 }
  0x86   :  { %1613 = vmatprep.mubr.msk.bf16.mxu0 %vm481_vm0, %v2044_v59  ;;  %1629 = vmatprep.mubr.msk.bf16.mxu1 %vm481_vm0, %v2080_v60 }
  0x8d   :  { %703 = vmatmul.mubr.bf16.gmra.mrb[44].mxu0 %v2046_v61  ;;  %831 = vmatmul.mubr.bf16.gmra.mrb[44].mxu1 %v2082_v62 }
  0x8e   :  { %1614 = vmatprep.mubr.msk.bf16.mxu0 %vm481_vm0, %v2050_v63  ;;  %1630 = vmatprep.mubr.msk.bf16.mxu1 %vm481_vm0, %v2083_v0 }
  0x95   :  { %711 = vmatmul.mubr.bf16.gmra.mrb[48].mxu0 %v2052_v1  ;;  %839 = vmatmul.mubr.bf16.gmra.mrb[48].mxu1 %v2085_v2 }
  0x96   :  { %1615 = vmatprep.mubr.msk.bf16.mxu0 %vm481_vm0, %v2056_v3  ;;  %1631 = vmatprep.mubr.msk.bf16.mxu1 %vm481_vm0, %v2086_v4 }
  0x9d   :  { %719 = vmatmul.mubr.bf16.gmra.mrb[52].mxu0 %v2058_v5  ;;  %847 = vmatmul.mubr.bf16.gmra.mrb[52].mxu1 %v2088_v6 }
  0x9e   :  { %1616 = vmatprep.mubr.msk.bf16.mxu0 %vm481_vm0, %v2062_v7  ;;  %1632 = vmatprep.mubr.msk.bf16.mxu1 %vm481_vm0, %v2089_v8 }
  0xa5   :  { %727 = vmatmul.mubr.bf16.gmra.mrb[56].mxu0 %v2064_v9  ;;  %855 = vmatmul.mubr.bf16.gmra.mrb[56].mxu1 %v2091_v10 }
  0xa6   :  { %1617 = vmatprep.mubr.msk.bf16.mxu0 %vm481_vm0, %v2068_v11  ;;  %1633 = vmatprep.mubr.msk.bf16.mxu1 %vm481_vm0, %v2092_v12 }
  0xad   :  { %735 = vmatmul.mubr.bf16.gmra.mrb[60].mxu0 %v2070_v13  ;;  %863 = vmatmul.mubr.bf16.gmra.mrb[60].mxu1 %v2094_v14 }
 0x108   :  { %v616_v15 = vpop.f32.mrb[0].mxu0  ;;  %v744_v16 = vpop.f32.mrb[0].mxu1 }
 0x109   :  { %v618_v17 = vpop.f32.mrb[1].mxu0  ;;  %v746_v18 = vpop.f32.mrb[1].mxu1 }
 0x10a   :  { %v619_v19 = vpop.f32.mrb[2].mxu0  ;;  %v747_v20 = vpop.f32.mrb[2].mxu1 }
 0x10b   :  { %v871_v21 = vpack.c.bf16 %v619_v19, %v616_v15  ;;  %v621_v22 = vpop.f32.mrb[3].mxu0  ;;  %v2498_v23 = vpack.c.bf16 %v747_v20, %v744_v16  ;;  %v749_v24 = vpop.f32.mrb[3].mxu1 }
 0x10d   :  { %1766 = vst [vmem:[#allocation4] sm:$0xff] %v871_v21   ;;  %1937 = vst [vmem:[#allocation4 + $0x80] sm:$0xff] %v2498_v23   ;;  %v1191_v25 = vunpack.c.l.bf16 %v871_v21  ;;  %v1192_v26 = vunpack.c.h.bf16 %v871_v21 }
 0x10f   :  { %v1328_v33 = vmul.f32 %v1191_v25, %v1191_v25  ;;  %v1329_v34 = vmul.f32 %v1192_v26, %v1192_v26  ;;  %v1256_v39 = vadd.f32 %v1192_v26, %v1191_v25 }
 0x110   :  { %v624_v27 = vpop.f32.mrb[4].mxu0  ;;  %v752_v28 = vpop.f32.mrb[4].mxu1 }
 0x111   :  { %v626_v29 = vpop.f32.mrb[5].mxu0  ;;  %v754_v30 = vpop.f32.mrb[5].mxu1  ;;  %v1392_v42 = vadd.f32 %v1329_v34, %v1328_v33 }
 0x112   :  { %v627_v31 = vpop.f32.mrb[6].mxu0  ;;  %v755_v32 = vpop.f32.mrb[6].mxu1 }
 0x113   :  { %v872_v35 = vpack.c.bf16 %v627_v31, %v624_v27  ;;  %v629_v36 = vpop.f32.mrb[7].mxu0  ;;  %v2501_v37 = vpack.c.bf16 %v755_v32, %v752_v28  ;;  %v757_v38 = vpop.f32.mrb[7].mxu1 }
 0x115   :  { %1922 = vst [vmem:[#allocation4 + $0x8] sm:$0xff] %v872_v35   ;;  %v1193_v40 = vunpack.c.l.bf16 %v872_v35  ;;  %v1194_v41 = vunpack.c.h.bf16 %v872_v35  ;;  %1938 = vst [vmem:[#allocation4 + $0x88] sm:$0xff] %v2501_v37  }
 0x117   :  { %v1257_v43 = vadd.f32 %v1256_v39, %v1193_v40  ;;  %v1330_v44 = vmul.f32 %v1193_v40, %v1193_v40  ;;  %v1331_v48 = vmul.f32 %v1194_v41, %v1194_v41 }
 0x118   :  { %v632_v45 = vpop.f32.mrb[8].mxu0  ;;  %v760_v46 = vpop.f32.mrb[8].mxu1 }
 0x119   :  { %v1258_v47 = vadd.f32 %v1257_v43, %v1194_v41  ;;  %v1393_v49 = vadd.f32 %v1392_v42, %v1330_v44  ;;  %v634_v50 = vpop.f32.mrb[9].mxu0  ;;  %v762_v51 = vpop.f32.mrb[9].mxu1 }
 0x11a   :  { %v635_v52 = vpop.f32.mrb[10].mxu0  ;;  %v763_v53 = vpop.f32.mrb[10].mxu1 }
 0x11b   :  { %v1394_v54 = vadd.f32 %v1393_v49, %v1331_v48  ;;  %v873_v55 = vpack.c.bf16 %v635_v52, %v632_v45  ;;  %v637_v56 = vpop.f32.mrb[11].mxu0  ;;  %v2504_v57 = vpack.c.bf16 %v763_v53, %v760_v46  ;;  %v765_v58 = vpop.f32.mrb[11].mxu1 }
 0x11d   :  { %1923 = vst [vmem:[#allocation4 + $0x10] sm:$0xff] %v873_v55   ;;  %v1195_v59 = vunpack.c.l.bf16 %v873_v55  ;;  %v1196_v60 = vunpack.c.h.bf16 %v873_v55  ;;  %1939 = vst [vmem:[#allocation4 + $0x90] sm:$0xff] %v2504_v57  }
 0x11f   :  { %v1259_v61 = vadd.f32 %v1258_v47, %v1195_v59  ;;  %v1332_v62 = vmul.f32 %v1195_v59, %v1195_v59  ;;  %v1333_v2 = vmul.f32 %v1196_v60, %v1196_v60 }
 0x120   :  { %v640_v63 = vpop.f32.mrb[12].mxu0  ;;  %v768_v0 = vpop.f32.mrb[12].mxu1 }
 0x121   :  { %v1260_v1 = vadd.f32 %v1259_v61, %v1196_v60  ;;  %v1395_v3 = vadd.f32 %v1394_v54, %v1332_v62  ;;  %v642_v4 = vpop.f32.mrb[13].mxu0  ;;  %v770_v5 = vpop.f32.mrb[13].mxu1 }
 0x122   :  { %v643_v6 = vpop.f32.mrb[14].mxu0  ;;  %v771_v7 = vpop.f32.mrb[14].mxu1 }
 0x123   :  { %v1396_v8 = vadd.f32 %v1395_v3, %v1333_v2  ;;  %v874_v9 = vpack.c.bf16 %v643_v6, %v640_v63  ;;  %v645_v10 = vpop.f32.mrb[15].mxu0  ;;  %v2507_v11 = vpack.c.bf16 %v771_v7, %v768_v0  ;;  %v773_v12 = vpop.f32.mrb[15].mxu1 }
 0x125   :  { %1924 = vst [vmem:[#allocation4 + $0x18] sm:$0xff] %v874_v9   ;;  %v1197_v13 = vunpack.c.l.bf16 %v874_v9  ;;  %v1198_v14 = vunpack.c.h.bf16 %v874_v9  ;;  %1940 = vst [vmem:[#allocation4 + $0x98] sm:$0xff] %v2507_v11  }
 0x127   :  { %v1261_v15 = vadd.f32 %v1260_v1, %v1197_v13  ;;  %v1334_v16 = vmul.f32 %v1197_v13, %v1197_v13  ;;  %v1335_v20 = vmul.f32 %v1198_v14, %v1198_v14 }
 0x128   :  { %v648_v17 = vpop.f32.mrb[16].mxu0  ;;  %v776_v18 = vpop.f32.mrb[16].mxu1 }
 0x129   :  { %v1262_v19 = vadd.f32 %v1261_v15, %v1198_v14  ;;  %v1397_v21 = vadd.f32 %v1396_v8, %v1334_v16  ;;  %v650_v22 = vpop.f32.mrb[17].mxu0  ;;  %v778_v24 = vpop.f32.mrb[17].mxu1 }
 0x12a   :  { %v651_v25 = vpop.f32.mrb[18].mxu0  ;;  %v779_v26 = vpop.f32.mrb[18].mxu1 }
 0x12b   :  { %v1398_v27 = vadd.f32 %v1397_v21, %v1335_v20  ;;  %v875_v28 = vpack.c.bf16 %v651_v25, %v648_v17  ;;  %v653_v29 = vpop.f32.mrb[19].mxu0  ;;  %v2510_v30 = vpack.c.bf16 %v779_v26, %v776_v18  ;;  %v781_v31 = vpop.f32.mrb[19].mxu1 }
 0x12d   :  { %1925 = vst [vmem:[#allocation4 + $0x20] sm:$0xff] %v875_v28   ;;  %v1199_v32 = vunpack.c.l.bf16 %v875_v28  ;;  %v1200_v33 = vunpack.c.h.bf16 %v875_v28  ;;  %1941 = vst [vmem:[#allocation4 + $0xa0] sm:$0xff] %v2510_v30  }
 0x12f   :  { %v1263_v34 = vadd.f32 %v1262_v19, %v1199_v32  ;;  %v1336_v35 = vmul.f32 %v1199_v32, %v1199_v32  ;;  %v1337_v40 = vmul.f32 %v1200_v33, %v1200_v33 }
 0x130   :  { %v656_v36 = vpop.f32.mrb[20].mxu0  ;;  %v784_v38 = vpop.f32.mrb[20].mxu1 }
 0x131   :  { %v1264_v39 = vadd.f32 %v1263_v34, %v1200_v33  ;;  %v1399_v41 = vadd.f32 %v1398_v27, %v1336_v35  ;;  %v658_v42 = vpop.f32.mrb[21].mxu0  ;;  %v786_v43 = vpop.f32.mrb[21].mxu1 }
 0x132   :  { %v659_v44 = vpop.f32.mrb[22].mxu0  ;;  %v787_v45 = vpop.f32.mrb[22].mxu1 }
 0x133   :  { %v1400_v46 = vadd.f32 %v1399_v41, %v1337_v40  ;;  %v876_v47 = vpack.c.bf16 %v659_v44, %v656_v36  ;;  %v661_v48 = vpop.f32.mrb[23].mxu0  ;;  %v2513_v49 = vpack.c.bf16 %v787_v45, %v784_v38  ;;  %v789_v50 = vpop.f32.mrb[23].mxu1 }
 0x135   :  { %1926 = vst [vmem:[#allocation4 + $0x28] sm:$0xff] %v876_v47   ;;  %v1201_v51 = vunpack.c.l.bf16 %v876_v47  ;;  %v1202_v52 = vunpack.c.h.bf16 %v876_v47  ;;  %1942 = vst [vmem:[#allocation4 + $0xa8] sm:$0xff] %v2513_v49  }
 0x137   :  { %v1265_v53 = vadd.f32 %v1264_v39, %v1201_v51  ;;  %v1338_v54 = vmul.f32 %v1201_v51, %v1201_v51  ;;  %v1339_v59 = vmul.f32 %v1202_v52, %v1202_v52  ;;  %v2168_v39 = vmov 0.0  }
 0x138   :  { %v664_v55 = vpop.f32.mrb[24].mxu0  ;;  %v792_v56 = vpop.f32.mrb[24].mxu1  ;;  %27 = vst [vmem:[#allocation2] sm:$0x1] %v2168_v39  ;;  %28 = vst [vmem:[#allocation3] sm:$0x1] %v2168_v39 }
 0x139   :  { %v1266_v58 = vadd.f32 %v1265_v53, %v1202_v52  ;;  %v1401_v60 = vadd.f32 %v1400_v46, %v1338_v54  ;;  %v666_v61 = vpop.f32.mrb[25].mxu0  ;;  %v794_v62 = vpop.f32.mrb[25].mxu1 }
 0x13a   :  { %v667_v63 = vpop.f32.mrb[26].mxu0  ;;  %v795_v0 = vpop.f32.mrb[26].mxu1 }
 0x13b   :  { %v1402_v1 = vadd.f32 %v1401_v60, %v1339_v59  ;;  %v877_v2 = vpack.c.bf16 %v667_v63, %v664_v55  ;;  %v669_v3 = vpop.f32.mrb[27].mxu0  ;;  %v2516_v4 = vpack.c.bf16 %v795_v0, %v792_v56  ;;  %v797_v5 = vpop.f32.mrb[27].mxu1 }
 0x13d   :  { %1927 = vst [vmem:[#allocation4 + $0x30] sm:$0xff] %v877_v2   ;;  %v1203_v6 = vunpack.c.l.bf16 %v877_v2  ;;  %v1204_v7 = vunpack.c.h.bf16 %v877_v2  ;;  %1943 = vst [vmem:[#allocation4 + $0xb0] sm:$0xff] %v2516_v4  }
 0x13f   :  { %v1267_v8 = vadd.f32 %v1266_v58, %v1203_v6  ;;  %v1340_v9 = vmul.f32 %v1203_v6, %v1203_v6  ;;  %v1341_v14 = vmul.f32 %v1204_v7, %v1204_v7 }
 0x140   :  { %v672_v10 = vpop.f32.mrb[28].mxu0  ;;  %v800_v12 = vpop.f32.mrb[28].mxu1 }
 0x141   :  { %v1268_v13 = vadd.f32 %v1267_v8, %v1204_v7  ;;  %v1403_v15 = vadd.f32 %v1402_v1, %v1340_v9  ;;  %v674_v16 = vpop.f32.mrb[29].mxu0  ;;  %v802_v17 = vpop.f32.mrb[29].mxu1 }
 0x142   :  { %v675_v18 = vpop.f32.mrb[30].mxu0  ;;  %v803_v19 = vpop.f32.mrb[30].mxu1 }
 0x143   :  { %v1404_v20 = vadd.f32 %v1403_v15, %v1341_v14  ;;  %v878_v21 = vpack.c.bf16 %v675_v18, %v672_v10  ;;  %v677_v22 = vpop.f32.mrb[31].mxu0  ;;  %v2519_v24 = vpack.c.bf16 %v803_v19, %v800_v12  ;;  %v805_v25 = vpop.f32.mrb[31].mxu1 }
 0x145   :  { %1928 = vst [vmem:[#allocation4 + $0x38] sm:$0xff] %v878_v21   ;;  %v1205_v26 = vunpack.c.l.bf16 %v878_v21  ;;  %v1206_v27 = vunpack.c.h.bf16 %v878_v21  ;;  %1944 = vst [vmem:[#allocation4 + $0xb8] sm:$0xff] %v2519_v24  }
 0x147   :  { %v1269_v28 = vadd.f32 %v1268_v13, %v1205_v26  ;;  %v1342_v29 = vmul.f32 %v1205_v26, %v1205_v26  ;;  %v1343_v34 = vmul.f32 %v1206_v27, %v1206_v27 }
 0x148   :  { %v680_v31 = vpop.f32.mrb[32].mxu0  ;;  %v808_v32 = vpop.f32.mrb[32].mxu1 }
 0x149   :  { %v1270_v33 = vadd.f32 %v1269_v28, %v1206_v27  ;;  %v1405_v35 = vadd.f32 %v1404_v20, %v1342_v29  ;;  %v682_v36 = vpop.f32.mrb[33].mxu0  ;;  %v810_v38 = vpop.f32.mrb[33].mxu1 }
 0x14a   :  { %v683_v40 = vpop.f32.mrb[34].mxu0  ;;  %v811_v41 = vpop.f32.mrb[34].mxu1 }
 0x14b   :  { %v1406_v42 = vadd.f32 %v1405_v35, %v1343_v34  ;;  %v879_v43 = vpack.c.bf16 %v683_v40, %v680_v31  ;;  %v685_v44 = vpop.f32.mrb[35].mxu0  ;;  %v2522_v45 = vpack.c.bf16 %v811_v41, %v808_v32  ;;  %v813_v46 = vpop.f32.mrb[35].mxu1 }
 0x14d   :  { %1929 = vst [vmem:[#allocation4 + $0x40] sm:$0xff] %v879_v43   ;;  %v1207_v47 = vunpack.c.l.bf16 %v879_v43  ;;  %v1208_v48 = vunpack.c.h.bf16 %v879_v43  ;;  %1945 = vst [vmem:[#allocation4 + $0xc0] sm:$0xff] %v2522_v45  }
 0x14f   :  { %v1271_v50 = vadd.f32 %v1270_v33, %v1207_v47  ;;  %v1344_v51 = vmul.f32 %v1207_v47, %v1207_v47  ;;  %v1345_v55 = vmul.f32 %v1208_v48, %v1208_v48 }
 0x150   :  { %v688_v52 = vpop.f32.mrb[36].mxu0  ;;  %v816_v53 = vpop.f32.mrb[36].mxu1 }
 0x151   :  { %v1272_v54 = vadd.f32 %v1271_v50, %v1208_v48  ;;  %v1407_v56 = vadd.f32 %v1406_v42, %v1344_v51  ;;  %v690_v58 = vpop.f32.mrb[37].mxu0  ;;  %v818_v59 = vpop.f32.mrb[37].mxu1 }
 0x152   :  { %v691_v60 = vpop.f32.mrb[38].mxu0  ;;  %v819_v61 = vpop.f32.mrb[38].mxu1 }
 0x153   :  { %v1408_v62 = vadd.f32 %v1407_v56, %v1345_v55  ;;  %v880_v63 = vpack.c.bf16 %v691_v60, %v688_v52  ;;  %v693_v0 = vpop.f32.mrb[39].mxu0  ;;  %v2525_v1 = vpack.c.bf16 %v819_v61, %v816_v53  ;;  %v821_v2 = vpop.f32.mrb[39].mxu1 }
 0x155   :  { %1930 = vst [vmem:[#allocation4 + $0x48] sm:$0xff] %v880_v63   ;;  %v1209_v3 = vunpack.c.l.bf16 %v880_v63  ;;  %v1210_v5 = vunpack.c.h.bf16 %v880_v63  ;;  %1946 = vst [vmem:[#allocation4 + $0xc8] sm:$0xff] %v2525_v1  }
 0x157   :  { %v1273_v6 = vadd.f32 %v1272_v54, %v1209_v3  ;;  %v1346_v7 = vmul.f32 %v1209_v3, %v1209_v3  ;;  %v1347_v12 = vmul.f32 %v1210_v5, %v1210_v5 }
 0x158   :  { %v696_v8 = vpop.f32.mrb[40].mxu0  ;;  %v824_v9 = vpop.f32.mrb[40].mxu1 }
 0x159   :  { %v1274_v10 = vadd.f32 %v1273_v6, %v1210_v5  ;;  %v1409_v13 = vadd.f32 %v1408_v62, %v1346_v7  ;;  %v698_v14 = vpop.f32.mrb[41].mxu0  ;;  %v826_v15 = vpop.f32.mrb[41].mxu1 }
 0x15a   :  { %v699_v16 = vpop.f32.mrb[42].mxu0  ;;  %v827_v17 = vpop.f32.mrb[42].mxu1 }
 0x15b   :  { %v1410_v18 = vadd.f32 %v1409_v13, %v1347_v12  ;;  %v881_v19 = vpack.c.bf16 %v699_v16, %v696_v8  ;;  %v701_v20 = vpop.f32.mrb[43].mxu0  ;;  %v2528_v21 = vpack.c.bf16 %v827_v17, %v824_v9  ;;  %v829_v22 = vpop.f32.mrb[43].mxu1 }
 0x15d   :  { %1931 = vst [vmem:[#allocation4 + $0x50] sm:$0xff] %v881_v19   ;;  %v1211_v25 = vunpack.c.l.bf16 %v881_v19  ;;  %v1212_v26 = vunpack.c.h.bf16 %v881_v19  ;;  %1947 = vst [vmem:[#allocation4 + $0xd0] sm:$0xff] %v2528_v21  }
 0x15f   :  { %v1275_v27 = vadd.f32 %v1274_v10, %v1211_v25  ;;  %v1348_v28 = vmul.f32 %v1211_v25, %v1211_v25  ;;  %v1349_v33 = vmul.f32 %v1212_v26, %v1212_v26 }
 0x160   :  { %v704_v29 = vpop.f32.mrb[44].mxu0  ;;  %v832_v31 = vpop.f32.mrb[44].mxu1 }
 0x161   :  { %v1276_v32 = vadd.f32 %v1275_v27, %v1212_v26  ;;  %v1411_v34 = vadd.f32 %v1410_v18, %v1348_v28  ;;  %v706_v35 = vpop.f32.mrb[45].mxu0  ;;  %v834_v36 = vpop.f32.mrb[45].mxu1 }
 0x162   :  { %v707_v38 = vpop.f32.mrb[46].mxu0  ;;  %v835_v39 = vpop.f32.mrb[46].mxu1 }
 0x163   :  { %v1412_v40 = vadd.f32 %v1411_v34, %v1349_v33  ;;  %v882_v41 = vpack.c.bf16 %v707_v38, %v704_v29  ;;  %v709_v42 = vpop.f32.mrb[47].mxu0  ;;  %v2531_v43 = vpack.c.bf16 %v835_v39, %v832_v31  ;;  %v837_v44 = vpop.f32.mrb[47].mxu1 }
 0x165   :  { %1932 = vst [vmem:[#allocation4 + $0x58] sm:$0xff] %v882_v41   ;;  %v1213_v46 = vunpack.c.l.bf16 %v882_v41  ;;  %v1214_v47 = vunpack.c.h.bf16 %v882_v41  ;;  %1948 = vst [vmem:[#allocation4 + $0xd8] sm:$0xff] %v2531_v43  }
 0x167   :  { %v1277_v48 = vadd.f32 %v1276_v32, %v1213_v46  ;;  %v1350_v50 = vmul.f32 %v1213_v46, %v1213_v46  ;;  %v1351_v54 = vmul.f32 %v1214_v47, %v1214_v47 }
 0x168   :  { %v712_v51 = vpop.f32.mrb[48].mxu0  ;;  %v840_v52 = vpop.f32.mrb[48].mxu1 }
 0x169   :  { %v1278_v53 = vadd.f32 %v1277_v48, %v1214_v47  ;;  %v1413_v55 = vadd.f32 %v1412_v40, %v1350_v50  ;;  %v714_v56 = vpop.f32.mrb[49].mxu0  ;;  %v842_v58 = vpop.f32.mrb[49].mxu1 }
 0x16a   :  { %v715_v59 = vpop.f32.mrb[50].mxu0  ;;  %v843_v60 = vpop.f32.mrb[50].mxu1 }
 0x16b   :  { %v1414_v61 = vadd.f32 %v1413_v55, %v1351_v54  ;;  %v883_v62 = vpack.c.bf16 %v715_v59, %v712_v51  ;;  %v717_v63 = vpop.f32.mrb[51].mxu0  ;;  %v2534_v0 = vpack.c.bf16 %v843_v60, %v840_v52  ;;  %v845_v2 = vpop.f32.mrb[51].mxu1 }
 0x16d   :  { %1933 = vst [vmem:[#allocation4 + $0x60] sm:$0xff] %v883_v62   ;;  %v1215_v3 = vunpack.c.l.bf16 %v883_v62  ;;  %v1216_v5 = vunpack.c.h.bf16 %v883_v62  ;;  %1949 = vst [vmem:[#allocation4 + $0xe0] sm:$0xff] %v2534_v0  }
 0x16f   :  { %v1279_v6 = vadd.f32 %v1278_v53, %v1215_v3  ;;  %v1352_v7 = vmul.f32 %v1215_v3, %v1215_v3  ;;  %v1353_v12 = vmul.f32 %v1216_v5, %v1216_v5 }
 0x170   :  { %v720_v8 = vpop.f32.mrb[52].mxu0  ;;  %v848_v9 = vpop.f32.mrb[52].mxu1 }
 0x171   :  { %v1280_v10 = vadd.f32 %v1279_v6, %v1216_v5  ;;  %v1415_v13 = vadd.f32 %v1414_v61, %v1352_v7  ;;  %v722_v14 = vpop.f32.mrb[53].mxu0  ;;  %v850_v15 = vpop.f32.mrb[53].mxu1 }
 0x172   :  { %v723_v16 = vpop.f32.mrb[54].mxu0  ;;  %v851_v17 = vpop.f32.mrb[54].mxu1 }
 0x173   :  { %v1416_v18 = vadd.f32 %v1415_v13, %v1353_v12  ;;  %v884_v19 = vpack.c.bf16 %v723_v16, %v720_v8  ;;  %v725_v20 = vpop.f32.mrb[55].mxu0  ;;  %v2537_v22 = vpack.c.bf16 %v851_v17, %v848_v9  ;;  %v853_v25 = vpop.f32.mrb[55].mxu1 }
 0x175   :  { %1934 = vst [vmem:[#allocation4 + $0x68] sm:$0xff] %v884_v19   ;;  %v1217_v26 = vunpack.c.l.bf16 %v884_v19  ;;  %v1218_v27 = vunpack.c.h.bf16 %v884_v19  ;;  %1950 = vst [vmem:[#allocation4 + $0xe8] sm:$0xff] %v2537_v22  }
 0x177   :  { %v1281_v28 = vadd.f32 %v1280_v10, %v1217_v26  ;;  %v1354_v29 = vmul.f32 %v1217_v26, %v1217_v26  ;;  %v1355_v34 = vmul.f32 %v1218_v27, %v1218_v27 }
 0x178   :  { %v728_v31 = vpop.f32.mrb[56].mxu0  ;;  %v856_v32 = vpop.f32.mrb[56].mxu1 }
 0x179   :  { %v1282_v33 = vadd.f32 %v1281_v28, %v1218_v27  ;;  %v1417_v35 = vadd.f32 %v1416_v18, %v1354_v29  ;;  %v730_v36 = vpop.f32.mrb[57].mxu0  ;;  %v858_v38 = vpop.f32.mrb[57].mxu1 }
 0x17a   :  { %v731_v39 = vpop.f32.mrb[58].mxu0  ;;  %v859_v40 = vpop.f32.mrb[58].mxu1 }
 0x17b   :  { %v1418_v41 = vadd.f32 %v1417_v35, %v1355_v34  ;;  %v885_v42 = vpack.c.bf16 %v731_v39, %v728_v31  ;;  %v733_v44 = vpop.f32.mrb[59].mxu0  ;;  %v2540_v46 = vpack.c.bf16 %v859_v40, %v856_v32  ;;  %v861_v47 = vpop.f32.mrb[59].mxu1 }
 0x17d   :  { %1935 = vst [vmem:[#allocation4 + $0x70] sm:$0xff] %v885_v42   ;;  %v1219_v48 = vunpack.c.l.bf16 %v885_v42  ;;  %v1220_v50 = vunpack.c.h.bf16 %v885_v42  ;;  %1951 = vst [vmem:[#allocation4 + $0xf0] sm:$0xff] %v2540_v46  }
 0x17f   :  { %v1283_v51 = vadd.f32 %v1282_v33, %v1219_v48  ;;  %v1356_v52 = vmul.f32 %v1219_v48, %v1219_v48  ;;  %v1357_v56 = vmul.f32 %v1220_v50, %v1220_v50 }
 0x180   :  { %v736_v53 = vpop.f32.mrb[60].mxu0  ;;  %v864_v54 = vpop.f32.mrb[60].mxu1 }
 0x181   :  { %v1284_v55 = vadd.f32 %v1283_v51, %v1220_v50  ;;  %v1419_v58 = vadd.f32 %v1418_v41, %v1356_v52  ;;  %v738_v59 = vpop.f32.mrb[61].mxu0  ;;  %v866_v60 = vpop.f32.mrb[61].mxu1 }
 0x182   :  { %v739_v61 = vpop.f32.mrb[62].mxu0  ;;  %v867_v62 = vpop.f32.mrb[62].mxu1 }
 0x183   :  { %v1420_v63 = vadd.f32 %v1419_v58, %v1357_v56  ;;  %v886_v2 = vpack.c.bf16 %v739_v61, %v736_v53  ;;  %v741_v3 = vpop.f32.mrb[63].mxu0  ;;  %v2543_v5 = vpack.c.bf16 %v867_v62, %v864_v54  ;;  %v869_v6 = vpop.f32.mrb[63].mxu1 }
 0x185   :  { %1936 = vst [vmem:[#allocation4 + $0x78] sm:$0xff] %v886_v2   ;;  %v1221_v7 = vunpack.c.l.bf16 %v886_v2  ;;  %v1222_v8 = vunpack.c.h.bf16 %v886_v2  ;;  %1952 = vst [vmem:[#allocation4 + $0xf8] sm:$0xff] %v2543_v5  }
 0x186   :  { %2108 = shalt.err (!%p2105_p4)
}
 0x187   :  { %s2109_s30 = scalar_lea.hbm %s2624_s4, 4096 }
 0x188   :  { %p2110_p5 = scmp.ne.s32.totalorder %s2624_s4, %s2109_s30  ;;  %p2113_p6 = scmp.lt.u32.totalorder %s2109_s30, %s2624_s4 }
 0x18a   :  { %p2115_p7 = pnand %p2113_p6, %p2110_p5 }
 0x18c   :  { %2118 = shalt.err (!%p2115_p7)
}
 0x18d   :  { %s2170_s10 = smov 64   ;;  %s2171_s11 = smov 4   ;;  %v1223_v9 = vunpack.c.l.bf16 %v2498_v23  ;;  %v1285_v10 = vadd.f32 %v1284_v55, %v1221_v7  ;;  %v1358_v12 = vmul.f32 %v1221_v7, %v1221_v7  ;;  %v1224_v13 = vunpack.c.h.bf16 %v2498_v23 }
 0x18e   :  { %1493 = dma.vmem_to_hbm [thread:$0]  %s1488_s26, 4096, %s2624_s4, [#allocation5], %s2170_s10, %s2170_s10, %s2171_s11   ;;  %v1359_v15 = vmul.f32 %v1222_v8, %v1222_v8  ;;  %v1225_v18 = vunpack.c.l.bf16 %v2501_v37  ;;  %v1226_v26 = vunpack.c.h.bf16 %v2501_v37  ;;  %v1227_v31 = vunpack.c.l.bf16 %v2504_v57 }
 0x18f   :  { %v1286_v14 = vadd.f32 %v1285_v10, %v1222_v8  ;;  %v1421_v16 = vadd.f32 %v1420_v63, %v1358_v12  ;;  %v1360_v17 = vmul.f32 %v1223_v9, %v1223_v9  ;;  %v1361_v25 = vmul.f32 %v1224_v13, %v1224_v13  ;;  %s2172_s15 = smov [#allocation6]   ;;  %s2173_s19 = smov [#allocation8]  }
 0x190   :  { %v1362_v29 = vmul.f32 %v1225_v18, %v1225_v18  ;;  %v1363_v34 = vmul.f32 %v1226_v26, %v1226_v26  ;;  %v1228_v23 = vunpack.c.h.bf16 %v2504_v57  ;;  %v1364_v38 = vmul.f32 %v1227_v31, %v1227_v31  ;;  %s1500_s16 = sshll.u32 %s2172_s15, 4  ;;  %s1510_s20 = sshll.u32 %s2173_s19, 4  ;;  %s1501_s16 = int_to_ptr.vmem [resolvable:$true] %s1500_s16  ;;  %s1511_s20 = int_to_ptr.vmem [resolvable:$true] %s1510_s20 }
 0x191   :  { %v1287_v19 = vadd.f32 %v1286_v14, %v1223_v9  ;;  %v1422_v20 = vadd.f32 %v1421_v16, %v1359_v15  ;;  %v1229_v39 = vunpack.c.l.bf16 %v2507_v11  ;;  %v1230_v37 = vunpack.c.h.bf16 %v2507_v11  ;;  %s2119_s21 = scalar_lea.vmem %s1501_s16, 16  ;;  %s2123_s22 = scalar_lea.vmem %s1501_s16, 32 }
 0x192   :  { %v1365_v42 = vmul.f32 %v1228_v23, %v1228_v23  ;;  %v1231_v50 = vunpack.c.l.bf16 %v2510_v30  ;;  %v1232_v57 = vunpack.c.h.bf16 %v2510_v30  ;;  %v1233_v58 = vunpack.c.l.bf16 %v2513_v49  ;;  %p2120_p8 = scmp.ne.s32.totalorder %s1501_s16, %s2119_s21  ;;  %p2124_p9 = scmp.lt.s32.totalorder %s1501_s16, %s1501_s16 }
 0x193   :  { %v1288_v27 = vadd.f32 %v1287_v19, %v1224_v13  ;;  %v1423_v28 = vadd.f32 %v1422_v20, %v1360_v17  ;;  %v1366_v48 = vmul.f32 %v1229_v39, %v1229_v39  ;;  %v1367_v53 = vmul.f32 %v1230_v37, %v1230_v37  ;;  %p2125_p10 = scmp.lt.s32.totalorder %s2123_s22, %s2119_s21 }
 0x194   :  { %v1368_v56 = vmul.f32 %v1231_v50, %v1231_v50  ;;  %v1369_v61 = vmul.f32 %v1232_v57, %v1232_v57  ;;  %v1234_v11 = vunpack.c.h.bf16 %v2513_v49  ;;  %v1370_v2 = vmul.f32 %v1233_v58, %v1233_v58 }
 0x195   :  { %v1289_v32 = vadd.f32 %v1288_v27, %v1225_v18  ;;  %v1424_v33 = vadd.f32 %v1423_v28, %v1361_v25  ;;  %v1235_v3 = vunpack.c.l.bf16 %v2516_v4  ;;  %v1236_v30 = vunpack.c.h.bf16 %v2516_v4  ;;  %p2126_p11 = por %p2125_p10, %p2124_p9 }
 0x196   :  { %v1371_v8 = vmul.f32 %v1234_v11, %v1234_v11  ;;  %v1237_v13 = vunpack.c.l.bf16 %v2519_v24  ;;  %v1238_v49 = vunpack.c.h.bf16 %v2519_v24  ;;  %v1239_v20 = vunpack.c.l.bf16 %v2522_v45 }
 0x197   :  { %v1290_v35 = vadd.f32 %v1289_v32, %v1226_v26  ;;  %v1425_v36 = vadd.f32 %v1424_v33, %v1362_v29  ;;  %v1372_v12 = vmul.f32 %v1235_v3, %v1235_v3  ;;  %v1373_v16 = vmul.f32 %v1236_v30, %v1236_v30  ;;  %p2127_p12 = pnand %p2126_p11, %p2120_p8 }
 0x198   :  { %v1374_v19 = vmul.f32 %v1237_v13, %v1237_v13  ;;  %v1375_v27 = vmul.f32 %v1238_v49, %v1238_v49  ;;  %v1240_v4 = vunpack.c.h.bf16 %v2522_v45  ;;  %v1376_v32 = vmul.f32 %v1239_v20, %v1239_v20 }
 0x199   :  { %v1291_v40 = vadd.f32 %v1290_v35, %v1227_v31  ;;  %v1426_v41 = vadd.f32 %v1425_v36, %v1363_v34  ;;  %v1241_v34 = vunpack.c.l.bf16 %v2525_v1  ;;  %v1242_v36 = vunpack.c.h.bf16 %v2525_v1 }
 0x19a   :  { %v1377_v35 = vmul.f32 %v1240_v4, %v1240_v4  ;;  %v1246_v1 = vunpack.c.h.bf16 %v2531_v43 }
 0x19b   :  { %v1292_v44 = vadd.f32 %v1291_v40, %v1228_v23  ;;  %v1427_v47 = vadd.f32 %v1426_v41, %v1364_v38  ;;  %v1378_v40 = vmul.f32 %v1241_v34, %v1241_v34  ;;  %v1243_v41 = vunpack.c.l.bf16 %v2528_v21 }
 0x19d   :  { %v1293_v51 = vadd.f32 %v1292_v44, %v1229_v39  ;;  %v1428_v52 = vadd.f32 %v1427_v47, %v1365_v42  ;;  %v1244_v44 = vunpack.c.h.bf16 %v2528_v21  ;;  %v1248_v21 = vunpack.c.h.bf16 %v2534_v0 }
 0x19f   :  { %v1294_v54 = vadd.f32 %v1293_v51, %v1230_v37  ;;  %v1429_v55 = vadd.f32 %v1428_v52, %v1366_v48  ;;  %v1379_v37 = vmul.f32 %v1242_v36, %v1242_v36  ;;  %v1245_v51 = vunpack.c.l.bf16 %v2531_v43 }
 0x1a0   :  { %v1250_v43 = vunpack.c.h.bf16 %v2537_v22 }
 0x1a1   :  { %v1430_v59 = vadd.f32 %v1429_v55, %v1367_v53  ;;  %v1295_v60 = vadd.f32 %v1294_v54, %v1231_v50  ;;  %v1380_v50 = vmul.f32 %v1243_v41, %v1243_v41  ;;  %v1381_v53 = vmul.f32 %v1244_v44, %v1244_v44 }
 0x1a3   :  { %v1296_v62 = vadd.f32 %v1295_v60, %v1232_v57  ;;  %v1431_v63 = vadd.f32 %v1430_v59, %v1368_v56  ;;  %v1382_v56 = vmul.f32 %v1245_v51, %v1245_v51  ;;  %v1383_v60 = vmul.f32 %v1246_v1, %v1246_v1 }
 0x1a5   :  { %v1297_v6 = vadd.f32 %v1296_v62, %v1233_v58  ;;  %v1432_v7 = vadd.f32 %v1431_v63, %v1369_v61  ;;  %v1247_v58 = vunpack.c.l.bf16 %v2534_v0  ;;  %v1252_v0 = vunpack.c.h.bf16 %v2540_v46 }
 0x1a7   :  { %v1298_v9 = vadd.f32 %v1297_v6, %v1234_v11  ;;  %v1433_v10 = vadd.f32 %v1432_v7, %v1370_v2  ;;  %v1384_v63 = vmul.f32 %v1247_v58, %v1247_v58  ;;  %v1249_v2 = vunpack.c.l.bf16 %v2537_v22 }
 0x1a8   :  { %v1385_v6 = vmul.f32 %v1248_v21, %v1248_v21  ;;  %v1254_v22 = vunpack.c.h.bf16 %v2543_v5 }
 0x1a9   :  { %v1299_v14 = vadd.f32 %v1298_v9, %v1235_v3  ;;  %v1434_v15 = vadd.f32 %v1433_v10, %v1371_v8  ;;  %v1386_v9 = vmul.f32 %v1249_v2, %v1249_v2  ;;  %v1251_v10 = vunpack.c.l.bf16 %v2540_v46 }
 0x1ab   :  { %v1300_v17 = vadd.f32 %v1299_v14, %v1236_v30  ;;  %v1435_v18 = vadd.f32 %v1434_v15, %v1372_v12 }
 0x1ad   :  { %v1301_v25 = vadd.f32 %v1300_v17, %v1237_v13  ;;  %v1436_v26 = vadd.f32 %v1435_v18, %v1373_v16  ;;  %v1387_v13 = vmul.f32 %v1250_v43, %v1250_v43  ;;  %v1253_v17 = vunpack.c.l.bf16 %v2543_v5  ;;  %v1327_v5 = vld [vmem:[#allocation3] sm:$0x1] }
 0x1af   :  { %v1302_v28 = vadd.f32 %v1301_v25, %v1238_v49  ;;  %v1437_v29 = vadd.f32 %v1436_v26, %v1374_v19  ;;  %v1388_v49 = vmul.f32 %v1251_v10, %v1251_v10  ;;  %v1389_v19 = vmul.f32 %v1252_v0, %v1252_v0 }
 0x1b1   :  { %v1303_v31 = vadd.f32 %v1302_v28, %v1239_v20  ;;  %v1438_v33 = vadd.f32 %v1437_v29, %v1375_v27  ;;  %v1390_v27 = vmul.f32 %v1253_v17, %v1253_v17  ;;  %v1391_v28 = vmul.f32 %v1254_v22, %v1254_v22 }
 0x1b3   :  { %v1304_v23 = vadd.f32 %v1303_v31, %v1240_v4  ;;  %v1439_v24 = vadd.f32 %v1438_v33, %v1376_v32 }
 0x1b5   :  { %v1440_v38 = vadd.f32 %v1439_v24, %v1377_v35  ;;  %v1305_v39 = vadd.f32 %v1304_v23, %v1241_v34 }
 0x1b7   :  { %v1306_v42 = vadd.f32 %v1305_v39, %v1242_v36  ;;  %v1441_v45 = vadd.f32 %v1440_v38, %v1378_v40  ;;  %v1255_v39 = vld [vmem:[#allocation2] sm:$0x1] }
 0x1b9   :  { %v1442_v47 = vadd.f32 %v1441_v45, %v1379_v37  ;;  %v1307_v48 = vadd.f32 %v1306_v42, %v1243_v41 }
 0x1bb   :  { %v1308_v52 = vadd.f32 %v1307_v48, %v1244_v44  ;;  %v1443_v57 = vadd.f32 %v1442_v47, %v1380_v50 }
 0x1bd   :  { %v1444_v54 = vadd.f32 %v1443_v57, %v1381_v53  ;;  %v1309_v55 = vadd.f32 %v1308_v52, %v1245_v51 }
 0x1bf   :  { %v1310_v59 = vadd.f32 %v1309_v55, %v1246_v1  ;;  %v1445_v61 = vadd.f32 %v1444_v54, %v1382_v56  ;;  %v1473_v1 = vld [vmem:[%s2622_s2] sm:$0x1] }
 0x1c0   :  { %v1478_v56 = vld [vmem:[%s2623_s3] sm:$0x1] }
 0x1c1   :  { %v1446_v11 = vadd.f32 %v1445_v61, %v1383_v60  ;;  %v1311_v62 = vadd.f32 %v1310_v59, %v1247_v58 }
 0x1c3   :  { %v1312_v3 = vadd.f32 %v1311_v62, %v1248_v21  ;;  %v1447_v7 = vadd.f32 %v1446_v11, %v1384_v63 }
 0x1c5   :  { %v1448_v8 = vadd.f32 %v1447_v7, %v1385_v6  ;;  %v1313_v30 = vadd.f32 %v1312_v3, %v1249_v2 }
 0x1c7   :  { %v1314_v12 = vadd.f32 %v1313_v30, %v1250_v43  ;;  %v1449_v14 = vadd.f32 %v1448_v8, %v1386_v9 }
 0x1c9   :  { %v1450_v15 = vadd.f32 %v1449_v14, %v1387_v13  ;;  %v1315_v16 = vadd.f32 %v1314_v12, %v1251_v10 }
 0x1cb   :  { %v1316_v18 = vadd.f32 %v1315_v16, %v1252_v0  ;;  %v1451_v20 = vadd.f32 %v1450_v15, %v1388_v49 }
 0x1cd   :  { %v1452_v25 = vadd.f32 %v1451_v20, %v1389_v19  ;;  %v1317_v26 = vadd.f32 %v1316_v18, %v1253_v17 }
 0x1cf   :  { %v1318_v4 = vadd.f32 %v1317_v26, %v1254_v22  ;;  %v1453_v29 = vadd.f32 %v1452_v25, %v1390_v27 }
 0x1d1   :  { %v1319_v31 = vrot.slane %v1318_v4, 4  ;;  %v1454_v32 = vadd.f32 %v1453_v29, %v1391_v28 }
 0x1d3   :  { %v1320_v33 = vadd.f32 %v1319_v31, %v1318_v4  ;;  %v1455_v46 = vrot.slane %v1454_v32, 4 }
 0x1d5   :  { %v1321_v34 = vrot.slane %v1320_v33, 2  ;;  %v1456_v23 = vadd.f32 %v1455_v46, %v1454_v32 }
 0x1d7   :  { %v1322_v35 = vadd.f32 %v1321_v34, %v1320_v33  ;;  %v1457_v24 = vrot.slane %v1456_v23, 2 }
 0x1d9   :  { %v1323_v36 = vrot.slane %v1322_v35, 1  ;;  %v1458_v38 = vadd.f32 %v1457_v24, %v1456_v23 }
 0x1db   :  { %v1324_v40 = vadd.f32 %v1323_v36, %v1322_v35  ;;  %v1459_v41 = vrot.slane %v1458_v38, 1 }
 0x1dd   :  { %v1325_v42 = vadd.f32 %v1324_v40, %v1255_v39  ;;  %v1460_v37 = vadd.f32 %v1459_v41, %v1458_v38 }
 0x1df   :  { %1326 = vst [vmem:[#allocation2] sm:$0x1] %v1325_v42  ;;  %v1461_v45 = vadd.f32 %v1460_v37, %v1327_v5 }
 0x1e1   :  { %1462 = vst [vmem:[#allocation3] sm:$0x1] %v1461_v45 }
 0x1e6   :  { %v1466_v44 = vld [vmem:[#allocation2] sm:$0x1] }
 0x1e7   :  { %v1467_v47 = vmul.f32 0.001953125, %v1466_v44 }
 0x1e8   :  { %v1468_v48 = vld [vmem:[#allocation3] sm:$0x1] }
 0x1e9   :  { %v1469_v50 = vmul.f32 0.001953125, %v1468_v48  ;;  %v1470_v51 = vmul.f32 %v1467_v47, %v1467_v47 }
 0x1eb   :  { %v1471_v52 = vsub.f32 %v1469_v50, %v1470_v51 }
 0x1ed   :  { %v1472_v53 = vmax.f32 %v1471_v52, 0.0 }
 0x1ef   :  { %v1474_v57 = vadd.f32 1e-05, %v1472_v53 }
 0x1f1   :  { %2095 = vrsqrt.f32 %v1474_v57 }
 0x1fb   :  { %v2096_v54 = vpop.eup %2095 }
 0x1fc   :  { %v1476_v55 = vmul.f32 %v2096_v54, %v1473_v1 }
 0x1fe   :  { %1477 = vst [vmem:[#allocation6] sm:$0x1] %v1476_v55  ;;  %v1479_v58 = vmul.f32 %v1476_v55, %v1467_v47 }
 0x1ff   :  { %2130 = shalt.err (!%p2127_p12)
}
 0x200   :  { %s2131_s24 = scalar_lea.hbm %s2625_s5, 16 }
 0x201   :  { %p2132_p13 = scmp.ne.s32.totalorder %s2625_s5, %s2131_s24  ;;  %p2135_p0 = scmp.lt.u32.totalorder %s2131_s24, %s2625_s5 }
 0x203   :  { %p2137_p1 = pnand %p2135_p0, %p2132_p13 }
 0x205   :  { %2140 = shalt.err (!%p2137_p1)
}
 0x206   :  { %1503 = dma.vmem_to_hbm [thread:$0]  %s1501_s16, 16, %s2625_s5, [#allocation7]   ;;  %v1480_v59 = vsub.f32 %v1478_v56, %v1479_v58 }
 0x207   :  { %s2141_s29 = scalar_lea.vmem %s1511_s20, 16  ;;  %s2145_s30 = scalar_lea.vmem %s1511_s20, 32 }
 0x208   :  { %1481 = vst [vmem:[#allocation8] sm:$0x1] %v1480_v59  ;;  %p2142_p2 = scmp.ne.s32.totalorder %s1511_s20, %s2141_s29  ;;  %p2146_p3 = scmp.lt.s32.totalorder %s1511_s20, %s1511_s20 }
 0x209   :  { %p2147_p4 = scmp.lt.s32.totalorder %s2145_s30, %s2141_s29 }
 0x20b   :  { %p2148_p5 = por %p2147_p4, %p2146_p3 }
 0x20d   :  { %p2149_p6 = pnand %p2148_p5, %p2142_p2 }
 0x20f   :  { %2152 = shalt.err (!%p2149_p6)
}
 0x210   :  { %s2153_s8 = scalar_lea.hbm %s2626_s6, 16 }
 0x211   :  { %p2154_p7 = scmp.ne.s32.totalorder %s2626_s6, %s2153_s8  ;;  %p2157_p8 = scmp.lt.u32.totalorder %s2153_s8, %s2626_s6 }
 0x213   :  { %p2159_p9 = pnand %p2157_p8, %p2154_p7 }
 0x215   :  { %2162 = shalt.err (!%p2159_p9)
}
 0x216   :  { %1513 = dma.vmem_to_hbm [thread:$0]  %s1511_s20, 16, %s2626_s6, [#allocation7]  }
 0x217   :  { %2163 = dma.done.wait [#allocation5], 4096  }
 0x218   :  { %2164 = vsyncadd [#allocation5], 4294963200 }
 0x219   :  { %2165 = dma.done.wait [#allocation7], 32  }
 0x21a   :  { %2166 = vsyncadd [#allocation7], 4294967264 }
 0x21b   :  { %1523 = vsyncpa [#allocation5], 1 }
 0x21c   :  { %1524 = vsyncpa [#allocation7], 1 }

</bundles_post_ra>
